<compile_context>
chip_gen: v7x
topology: tpu7x:2x2x1
jax: 0.10.0
libtpu: 0.0.40
codegen_flags: <defaults>
</compile_context>

<pallas_src>
import functools
import math

import jax
import jax.numpy as jnp
from jax import lax
from jax.experimental import pallas as pl
from jax.experimental.pallas import tpu as pltpu


def _cross_attention_kernel(x_ref, ctx_ref, wq_ref, wk_ref, wv_ref, wp_ref,
                            bp_ref, o_ref, *, num_heads, scale):
    # x_ref: (1, tq, D), ctx_ref: (1, Tk, D), weights: (D, D), bias: (1, D)
    x = x_ref[0]                       # (tq, D)
    ctx = ctx_ref[0]                   # (Tk, D)
    dt = x_ref.dtype                   # MXU operand dtype (bf16 in -> bf16 ops)
    D = x.shape[-1]
    Dh = D // num_heads

    # Full-width projections: one (T, D) @ (D, D) matmul each, f32 accumulation.
    q = jnp.dot(x, wq_ref[...], preferred_element_type=jnp.float32).astype(dt)
    k = jnp.dot(ctx, wk_ref[...], preferred_element_type=jnp.float32).astype(dt)
    v = jnp.dot(ctx, wv_ref[...], preferred_element_type=jnp.float32).astype(dt)

    # Per-head attention; heads are a static (fully unrolled) loop with static
    # lane slices, so there is no dynamic slicing inside the kernel.
    head_outs = []
    for h in range(num_heads):
        lo = h * Dh
        q_h = q[:, lo:lo + Dh]                                     # (tq, Dh)
        k_h = k[:, lo:lo + Dh]                                     # (Tk, Dh)
        v_h = v[:, lo:lo + Dh]                                     # (Tk, Dh)

        s = lax.dot_general(q_h, k_h, (((1,), (1,)), ((), ())),
                            preferred_element_type=jnp.float32) * scale  # (tq, Tk)
        # Numerically stable softmax, kept in f32.
        m = jnp.max(s, axis=-1, keepdims=True)
        p = jnp.exp(s - m)
        l = jnp.sum(p, axis=-1, keepdims=True)                     # (tq, 1)
        pv = jnp.dot(p.astype(dt), v_h,
                     preferred_element_type=jnp.float32)           # (tq, Dh)
        # Deferred normalization: divide the (tq, Dh) result, not (tq, Tk) p.
        head_outs.append((pv / l).astype(dt))

    attn = jnp.concatenate(head_outs, axis=-1)                     # (tq, D)

    # Output projection: single (tq, D) @ (D, D) matmul + bias.
    out = jnp.dot(attn, wp_ref[...], preferred_element_type=jnp.float32)
    o_ref[0] = (out + bp_ref[...].astype(jnp.float32)).astype(o_ref.dtype)


@functools.partial(jax.jit, static_argnames=("num_heads", "tq"))
def cross_attention(x, context, wq, wkv, wp, bp, *, num_heads, tq=None):
    """x: (B, Tq, D); context: (B, Tk, D); wq: (D, D); wkv: (2D, D);
    wp: (D, D); bp: (D,).  Weights use the PyTorch nn.Linear (out, in) layout."""
    B, Tq, D = x.shape
    _, Tk, _ = context.shape
    H = num_heads
    Dh = D // H
    scale = 1.0 / math.sqrt(Dh)

    if tq is None:
        # Largest query tile that keeps a step's VMEM footprint comfortable on
        # v7x (64 MiB); small sequences use a single full tile.
        tq = Tq if Tq <= 512 else 512
    nq = pl.cdiv(Tq, tq)

    dt = x.dtype

    # ---- tiny weight re-layouts (D x D only; all lane-dense, last dim = D) --
    # q = x @ wq.T; feature order is already (h d).
    wqT = wq.T.astype(dt)                                   # (D, D)
    # kv = context @ wkv.T; feature order (h, 2*Dh) then chunked into k | v.
    wkvT = wkv.T.reshape(D, H, 2 * Dh)
    wkT = wkvT[:, :, :Dh].reshape(D, D).astype(dt)          # (D, D), cols (h d)
    wvT = wkvT[:, :, Dh:].reshape(D, D).astype(dt)          # (D, D), cols (h d)
    # out = attn_flat @ wp.T; attn_flat columns are (h d), matching our concat.
    wpT = wp.T.astype(dt)                                   # (D, D)
    bp2 = bp.reshape(1, D)

    kernel = functools.partial(_cross_attention_kernel,
                               num_heads=H, scale=scale)

    return pl.pallas_call(
        kernel,
        out_shape=jax.ShapeDtypeStruct((B, Tq, D), x.dtype),
        grid_spec=pltpu.PrefetchScalarGridSpec(
            num_scalar_prefetch=0,
            grid=(B, nq),
            in_specs=[
                pl.BlockSpec((1, tq, D), lambda b, t: (b, t, 0)),   # x tile
                pl.BlockSpec((1, Tk, D), lambda b, t: (b, 0, 0)),   # context
                # Grid-invariant weights: constant block index -> DMA'd once,
                # VMEM-resident across the whole grid.
                pl.BlockSpec((D, D), lambda b, t: (0, 0)),          # Wq^T
                pl.BlockSpec((D, D), lambda b, t: (0, 0)),          # Wk^T
                pl.BlockSpec((D, D), lambda b, t: (0, 0)),          # Wv^T
                pl.BlockSpec((D, D), lambda b, t: (0, 0)),          # Wp^T
                pl.BlockSpec((1, D), lambda b, t: (0, 0)),          # proj bias
            ],
            out_specs=pl.BlockSpec((1, tq, D), lambda b, t: (b, t, 0)),
        ),
        compiler_params=pltpu.CompilerParams(
            dimension_semantics=("parallel", "parallel"),
        ),
    )(x, context, wqT, wkT, wvT, wpT, bp2)


def _reference(x, context, wq, wkv, wp, bp, num_heads):
    """Pure-JAX replica of the PyTorch forward (eval mode)."""
    B, Tq, D = x.shape
    _, Tk, _ = context.shape
    Dh = D // num_heads
    q = x @ wq.T                                              # (B, Tq, D)
    kv = context @ wkv.T                                      # (B, Tk, 2D)
    q = q.reshape(B, Tq, num_heads, Dh).transpose(0, 2, 1, 3)
    kv = kv.reshape(B, Tk, num_heads, 2 * Dh).transpose(0, 2, 1, 3)
    k, v = kv[..., :Dh], kv[..., Dh:]
    s = jnp.einsum('bhqd,bhkd->bhqk', q, k) / math.sqrt(Dh)
    p = jax.nn.softmax(s, axis=-1)
    o = jnp.einsum('bhqk,bhkd->bhqd', p, v)
    o = o.transpose(0, 2, 1, 3).reshape(B, Tq, D)
    return o @ wp.T + bp


if __name__ == "__main__":
    # Small shapes consistent with the module: dim=32, num_heads=8 (head_dim=4),
    # batch=2, query seq=8, context seq=16.
    B, Tq, Tk, D, H = 2, 8, 16, 32, 8

    key = jax.random.PRNGKey(0)
    kx, kc, kq, kkv, kp, kb = jax.random.split(key, 6)
    x = jax.random.normal(kx, (B, Tq, D), dtype=jnp.float32)
    context = jax.random.normal(kc, (B, Tk, D), dtype=jnp.float32)
    wq = 0.1 * jax.random.normal(kq, (D, D), dtype=jnp.float32)
    wkv = 0.1 * jax.random.normal(kkv, (2 * D, D), dtype=jnp.float32)
    wp = 0.1 * jax.random.normal(kp, (D, D), dtype=jnp.float32)
    bp = 0.01 * jax.random.normal(kb, (D,), dtype=jnp.float32)

    out = cross_attention(x, context, wq, wkv, wp, bp, num_heads=H)
    out = jax.block_until_ready(out)

    ref = _reference(x, context, wq, wkv, wp, bp, H)
    assert out.shape == (B, Tq, D)
    assert jnp.allclose(out, ref, atol=1e-4, rtol=1e-4), float(
        jnp.max(jnp.abs(out - ref)))

    # TODO(synk): attn_drop / proj_drop are identity here (eval-mode forward);
    # qkv_bias=False matches the module's default constructor arguments.
    print("KERNEL_OK")
</pallas_src>

<mosaic_0001>
module attributes {stable_mosaic.version = 11 : i64} {
  func.func @_cross_attention_kernel(%arg0: i32, %arg1: i32, %arg2: memref<1x8x32xf32, #tpu.memory_space<vmem>>, %arg3: memref<1x16x32xf32, #tpu.memory_space<vmem>>, %arg4: memref<32x32xf32, #tpu.memory_space<vmem>>, %arg5: memref<32x32xf32, #tpu.memory_space<vmem>>, %arg6: memref<32x32xf32, #tpu.memory_space<vmem>>, %arg7: memref<32x32xf32, #tpu.memory_space<vmem>>, %arg8: memref<1x32xf32, #tpu.memory_space<vmem>>, %arg9: memref<1x8x32xf32, #tpu.memory_space<vmem>>) attributes {dimension_semantics = [#tpu.dimension_semantics<parallel>, #tpu.dimension_semantics<parallel>], iteration_bounds = array<i64: 2, 1>, scalar_prefetch = 0 : i64, scratch_operands = 0 : i64, tpu.core_type = #tpu.core_type<tc>, window_params = [{transform_indices = @transform_0, window_bounds = array<i64: 1, 8, 32>}, {transform_indices = @transform_1, window_bounds = array<i64: 1, 16, 32>}, {pipeline_mode = #tpu.pipeline_mode<synchronous>, transform_indices = @transform_2, window_bounds = array<i64: 32, 32>}, {pipeline_mode = #tpu.pipeline_mode<synchronous>, transform_indices = @transform_3, window_bounds = array<i64: 32, 32>}, {pipeline_mode = #tpu.pipeline_mode<synchronous>, transform_indices = @transform_4, window_bounds = array<i64: 32, 32>}, {pipeline_mode = #tpu.pipeline_mode<synchronous>, transform_indices = @transform_5, window_bounds = array<i64: 32, 32>}, {pipeline_mode = #tpu.pipeline_mode<synchronous>, transform_indices = @transform_6, window_bounds = array<i64: 1, 32>}, {transform_indices = @transform_7, window_bounds = array<i64: 1, 8, 32>}]} {
    %c0 = arith.constant 0 : index
    %c0_0 = arith.constant 0 : index
    %c0_1 = arith.constant 0 : index
    %0 = vector.load %arg2[%c0, %c0_0, %c0_1] : memref<1x8x32xf32, #tpu.memory_space<vmem>>, vector<1x8x32xf32>
    %1 = vector.shape_cast %0 : vector<1x8x32xf32> to vector<8x32xf32>
    %c0_2 = arith.constant 0 : index
    %c0_3 = arith.constant 0 : index
    %c0_4 = arith.constant 0 : index
    %2 = vector.load %arg3[%c0_2, %c0_3, %c0_4] : memref<1x16x32xf32, #tpu.memory_space<vmem>>, vector<1x16x32xf32>
    %3 = vector.shape_cast %2 : vector<1x16x32xf32> to vector<16x32xf32>
    %c0_5 = arith.constant 0 : index
    %c0_6 = arith.constant 0 : index
    %4 = vector.load %arg4[%c0_5, %c0_6] : memref<32x32xf32, #tpu.memory_space<vmem>>, vector<32x32xf32>
    %cst = arith.constant dense<0.000000e+00> : vector<8x32xf32>
    %5 = tpu.matmul %1, %4, %cst {dimension_numbers = #tpu.dot_dimension_numbers<[1], [0], [0], [1], [0, 0, 1, 1], [], []>} : vector<8x32xf32>, vector<32x32xf32>, vector<8x32xf32> -> vector<8x32xf32>
    %c0_7 = arith.constant 0 : index
    %c0_8 = arith.constant 0 : index
    %6 = vector.load %arg5[%c0_7, %c0_8] : memref<32x32xf32, #tpu.memory_space<vmem>>, vector<32x32xf32>
    %cst_9 = arith.constant dense<0.000000e+00> : vector<16x32xf32>
    %7 = tpu.matmul %3, %6, %cst_9 {dimension_numbers = #tpu.dot_dimension_numbers<[1], [0], [0], [1], [0, 0, 1, 1], [], []>} : vector<16x32xf32>, vector<32x32xf32>, vector<16x32xf32> -> vector<16x32xf32>
    %c0_10 = arith.constant 0 : index
    %c0_11 = arith.constant 0 : index
    %8 = vector.load %arg6[%c0_10, %c0_11] : memref<32x32xf32, #tpu.memory_space<vmem>>, vector<32x32xf32>
    %cst_12 = arith.constant dense<0.000000e+00> : vector<16x32xf32>
    %9 = tpu.matmul %3, %8, %cst_12 {dimension_numbers = #tpu.dot_dimension_numbers<[1], [0], [0], [1], [0, 0, 1, 1], [], []>} : vector<16x32xf32>, vector<32x32xf32>, vector<16x32xf32> -> vector<16x32xf32>
    %10 = vector.extract_strided_slice %5 {offsets = [0, 0], sizes = [8, 4], strides = [1, 1]} : vector<8x32xf32> to vector<8x4xf32>
    %11 = vector.extract_strided_slice %7 {offsets = [0, 0], sizes = [16, 4], strides = [1, 1]} : vector<16x32xf32> to vector<16x4xf32>
    %12 = vector.extract_strided_slice %9 {offsets = [0, 0], sizes = [16, 4], strides = [1, 1]} : vector<16x32xf32> to vector<16x4xf32>
    %cst_13 = arith.constant dense<0.000000e+00> : vector<8x16xf32>
    %13 = tpu.matmul %10, %11, %cst_13 {dimension_numbers = #tpu.dot_dimension_numbers<[1], [1], [0], [0], [0, 0, 1, 0], [], []>} : vector<8x4xf32>, vector<16x4xf32>, vector<8x16xf32> -> vector<8x16xf32>
    %cst_14 = arith.constant 5.000000e-01 : f32
    %14 = vector.broadcast %cst_14 : f32 to vector<8x16xf32>
    %15 = arith.mulf %13, %14 : vector<8x16xf32>
    %cst_15 = arith.constant dense<0xFF800000> : vector<8xf32>
    %16 = vector.multi_reduction <maximumf>, %15, %cst_15 [1] : vector<8x16xf32> to vector<8xf32>
    %17 = vector.shape_cast %16 : vector<8xf32> to vector<8x1xf32>
    %18 = vector.broadcast %17 : vector<8x1xf32> to vector<8x16xf32>
    %19 = arith.subf %15, %18 : vector<8x16xf32>
    %20 = math.exp %19 : vector<8x16xf32>
    %cst_16 = arith.constant dense<0.000000e+00> : vector<8xf32>
    %21 = vector.multi_reduction <add>, %20, %cst_16 [1] : vector<8x16xf32> to vector<8xf32>
    %22 = vector.shape_cast %21 : vector<8xf32> to vector<8x1xf32>
    %cst_17 = arith.constant dense<0.000000e+00> : vector<8x4xf32>
    %23 = tpu.matmul %20, %12, %cst_17 {dimension_numbers = #tpu.dot_dimension_numbers<[1], [0], [0], [1], [0, 0, 1, 1], [], []>} : vector<8x16xf32>, vector<16x4xf32>, vector<8x4xf32> -> vector<8x4xf32>
    %24 = vector.broadcast %22 : vector<8x1xf32> to vector<8x4xf32>
    %25 = arith.divf %23, %24 : vector<8x4xf32>
    %26 = vector.extract_strided_slice %5 {offsets = [0, 4], sizes = [8, 4], strides = [1, 1]} : vector<8x32xf32> to vector<8x4xf32>
    %27 = vector.extract_strided_slice %7 {offsets = [0, 4], sizes = [16, 4], strides = [1, 1]} : vector<16x32xf32> to vector<16x4xf32>
    %28 = vector.extract_strided_slice %9 {offsets = [0, 4], sizes = [16, 4], strides = [1, 1]} : vector<16x32xf32> to vector<16x4xf32>
    %cst_18 = arith.constant dense<0.000000e+00> : vector<8x16xf32>
    %29 = tpu.matmul %26, %27, %cst_18 {dimension_numbers = #tpu.dot_dimension_numbers<[1], [1], [0], [0], [0, 0, 1, 0], [], []>} : vector<8x4xf32>, vector<16x4xf32>, vector<8x16xf32> -> vector<8x16xf32>
    %cst_19 = arith.constant 5.000000e-01 : f32
    %30 = vector.broadcast %cst_19 : f32 to vector<8x16xf32>
    %31 = arith.mulf %29, %30 : vector<8x16xf32>
    %cst_20 = arith.constant dense<0xFF800000> : vector<8xf32>
    %32 = vector.multi_reduction <maximumf>, %31, %cst_20 [1] : vector<8x16xf32> to vector<8xf32>
    %33 = vector.shape_cast %32 : vector<8xf32> to vector<8x1xf32>
    %34 = vector.broadcast %33 : vector<8x1xf32> to vector<8x16xf32>
    %35 = arith.subf %31, %34 : vector<8x16xf32>
    %36 = math.exp %35 : vector<8x16xf32>
    %cst_21 = arith.constant dense<0.000000e+00> : vector<8xf32>
    %37 = vector.multi_reduction <add>, %36, %cst_21 [1] : vector<8x16xf32> to vector<8xf32>
    %38 = vector.shape_cast %37 : vector<8xf32> to vector<8x1xf32>
    %cst_22 = arith.constant dense<0.000000e+00> : vector<8x4xf32>
    %39 = tpu.matmul %36, %28, %cst_22 {dimension_numbers = #tpu.dot_dimension_numbers<[1], [0], [0], [1], [0, 0, 1, 1], [], []>} : vector<8x16xf32>, vector<16x4xf32>, vector<8x4xf32> -> vector<8x4xf32>
    %40 = vector.broadcast %38 : vector<8x1xf32> to vector<8x4xf32>
    %41 = arith.divf %39, %40 : vector<8x4xf32>
    %42 = vector.extract_strided_slice %5 {offsets = [0, 8], sizes = [8, 4], strides = [1, 1]} : vector<8x32xf32> to vector<8x4xf32>
    %43 = vector.extract_strided_slice %7 {offsets = [0, 8], sizes = [16, 4], strides = [1, 1]} : vector<16x32xf32> to vector<16x4xf32>
    %44 = vector.extract_strided_slice %9 {offsets = [0, 8], sizes = [16, 4], strides = [1, 1]} : vector<16x32xf32> to vector<16x4xf32>
    %cst_23 = arith.constant dense<0.000000e+00> : vector<8x16xf32>
    %45 = tpu.matmul %42, %43, %cst_23 {dimension_numbers = #tpu.dot_dimension_numbers<[1], [1], [0], [0], [0, 0, 1, 0], [], []>} : vector<8x4xf32>, vector<16x4xf32>, vector<8x16xf32> -> vector<8x16xf32>
    %cst_24 = arith.constant 5.000000e-01 : f32
    %46 = vector.broadcast %cst_24 : f32 to vector<8x16xf32>
    %47 = arith.mulf %45, %46 : vector<8x16xf32>
    %cst_25 = arith.constant dense<0xFF800000> : vector<8xf32>
    %48 = vector.multi_reduction <maximumf>, %47, %cst_25 [1] : vector<8x16xf32> to vector<8xf32>
    %49 = vector.shape_cast %48 : vector<8xf32> to vector<8x1xf32>
    %50 = vector.broadcast %49 : vector<8x1xf32> to vector<8x16xf32>
    %51 = arith.subf %47, %50 : vector<8x16xf32>
    %52 = math.exp %51 : vector<8x16xf32>
    %cst_26 = arith.constant dense<0.000000e+00> : vector<8xf32>
    %53 = vector.multi_reduction <add>, %52, %cst_26 [1] : vector<8x16xf32> to vector<8xf32>
    %54 = vector.shape_cast %53 : vector<8xf32> to vector<8x1xf32>
    %cst_27 = arith.constant dense<0.000000e+00> : vector<8x4xf32>
    %55 = tpu.matmul %52, %44, %cst_27 {dimension_numbers = #tpu.dot_dimension_numbers<[1], [0], [0], [1], [0, 0, 1, 1], [], []>} : vector<8x16xf32>, vector<16x4xf32>, vector<8x4xf32> -> vector<8x4xf32>
    %56 = vector.broadcast %54 : vector<8x1xf32> to vector<8x4xf32>
    %57 = arith.divf %55, %56 : vector<8x4xf32>
    %58 = vector.extract_strided_slice %5 {offsets = [0, 12], sizes = [8, 4], strides = [1, 1]} : vector<8x32xf32> to vector<8x4xf32>
    %59 = vector.extract_strided_slice %7 {offsets = [0, 12], sizes = [16, 4], strides = [1, 1]} : vector<16x32xf32> to vector<16x4xf32>
    %60 = vector.extract_strided_slice %9 {offsets = [0, 12], sizes = [16, 4], strides = [1, 1]} : vector<16x32xf32> to vector<16x4xf32>
    %cst_28 = arith.constant dense<0.000000e+00> : vector<8x16xf32>
    %61 = tpu.matmul %58, %59, %cst_28 {dimension_numbers = #tpu.dot_dimension_numbers<[1], [1], [0], [0], [0, 0, 1, 0], [], []>} : vector<8x4xf32>, vector<16x4xf32>, vector<8x16xf32> -> vector<8x16xf32>
    %cst_29 = arith.constant 5.000000e-01 : f32
    %62 = vector.broadcast %cst_29 : f32 to vector<8x16xf32>
    %63 = arith.mulf %61, %62 : vector<8x16xf32>
    %cst_30 = arith.constant dense<0xFF800000> : vector<8xf32>
    %64 = vector.multi_reduction <maximumf>, %63, %cst_30 [1] : vector<8x16xf32> to vector<8xf32>
    %65 = vector.shape_cast %64 : vector<8xf32> to vector<8x1xf32>
    %66 = vector.broadcast %65 : vector<8x1xf32> to vector<8x16xf32>
    %67 = arith.subf %63, %66 : vector<8x16xf32>
    %68 = math.exp %67 : vector<8x16xf32>
    %cst_31 = arith.constant dense<0.000000e+00> : vector<8xf32>
    %69 = vector.multi_reduction <add>, %68, %cst_31 [1] : vector<8x16xf32> to vector<8xf32>
    %70 = vector.shape_cast %69 : vector<8xf32> to vector<8x1xf32>
    %cst_32 = arith.constant dense<0.000000e+00> : vector<8x4xf32>
    %71 = tpu.matmul %68, %60, %cst_32 {dimension_numbers = #tpu.dot_dimension_numbers<[1], [0], [0], [1], [0, 0, 1, 1], [], []>} : vector<8x16xf32>, vector<16x4xf32>, vector<8x4xf32> -> vector<8x4xf32>
    %72 = vector.broadcast %70 : vector<8x1xf32> to vector<8x4xf32>
    %73 = arith.divf %71, %72 : vector<8x4xf32>
    %74 = vector.extract_strided_slice %5 {offsets = [0, 16], sizes = [8, 4], strides = [1, 1]} : vector<8x32xf32> to vector<8x4xf32>
    %75 = vector.extract_strided_slice %7 {offsets = [0, 16], sizes = [16, 4], strides = [1, 1]} : vector<16x32xf32> to vector<16x4xf32>
    %76 = vector.extract_strided_slice %9 {offsets = [0, 16], sizes = [16, 4], strides = [1, 1]} : vector<16x32xf32> to vector<16x4xf32>
    %cst_33 = arith.constant dense<0.000000e+00> : vector<8x16xf32>
    %77 = tpu.matmul %74, %75, %cst_33 {dimension_numbers = #tpu.dot_dimension_numbers<[1], [1], [0], [0], [0, 0, 1, 0], [], []>} : vector<8x4xf32>, vector<16x4xf32>, vector<8x16xf32> -> vector<8x16xf32>
    %cst_34 = arith.constant 5.000000e-01 : f32
    %78 = vector.broadcast %cst_34 : f32 to vector<8x16xf32>
    %79 = arith.mulf %77, %78 : vector<8x16xf32>
    %cst_35 = arith.constant dense<0xFF800000> : vector<8xf32>
    %80 = vector.multi_reduction <maximumf>, %79, %cst_35 [1] : vector<8x16xf32> to vector<8xf32>
    %81 = vector.shape_cast %80 : vector<8xf32> to vector<8x1xf32>
    %82 = vector.broadcast %81 : vector<8x1xf32> to vector<8x16xf32>
    %83 = arith.subf %79, %82 : vector<8x16xf32>
    %84 = math.exp %83 : vector<8x16xf32>
    %cst_36 = arith.constant dense<0.000000e+00> : vector<8xf32>
    %85 = vector.multi_reduction <add>, %84, %cst_36 [1] : vector<8x16xf32> to vector<8xf32>
    %86 = vector.shape_cast %85 : vector<8xf32> to vector<8x1xf32>
    %cst_37 = arith.constant dense<0.000000e+00> : vector<8x4xf32>
    %87 = tpu.matmul %84, %76, %cst_37 {dimension_numbers = #tpu.dot_dimension_numbers<[1], [0], [0], [1], [0, 0, 1, 1], [], []>} : vector<8x16xf32>, vector<16x4xf32>, vector<8x4xf32> -> vector<8x4xf32>
    %88 = vector.broadcast %86 : vector<8x1xf32> to vector<8x4xf32>
    %89 = arith.divf %87, %88 : vector<8x4xf32>
    %90 = vector.extract_strided_slice %5 {offsets = [0, 20], sizes = [8, 4], strides = [1, 1]} : vector<8x32xf32> to vector<8x4xf32>
    %91 = vector.extract_strided_slice %7 {offsets = [0, 20], sizes = [16, 4], strides = [1, 1]} : vector<16x32xf32> to vector<16x4xf32>
    %92 = vector.extract_strided_slice %9 {offsets = [0, 20], sizes = [16, 4], strides = [1, 1]} : vector<16x32xf32> to vector<16x4xf32>
    %cst_38 = arith.constant dense<0.000000e+00> : vector<8x16xf32>
    %93 = tpu.matmul %90, %91, %cst_38 {dimension_numbers = #tpu.dot_dimension_numbers<[1], [1], [0], [0], [0, 0, 1, 0], [], []>} : vector<8x4xf32>, vector<16x4xf32>, vector<8x16xf32> -> vector<8x16xf32>
    %cst_39 = arith.constant 5.000000e-01 : f32
    %94 = vector.broadcast %cst_39 : f32 to vector<8x16xf32>
    %95 = arith.mulf %93, %94 : vector<8x16xf32>
    %cst_40 = arith.constant dense<0xFF800000> : vector<8xf32>
    %96 = vector.multi_reduction <maximumf>, %95, %cst_40 [1] : vector<8x16xf32> to vector<8xf32>
    %97 = vector.shape_cast %96 : vector<8xf32> to vector<8x1xf32>
    %98 = vector.broadcast %97 : vector<8x1xf32> to vector<8x16xf32>
    %99 = arith.subf %95, %98 : vector<8x16xf32>
    %100 = math.exp %99 : vector<8x16xf32>
    %cst_41 = arith.constant dense<0.000000e+00> : vector<8xf32>
    %101 = vector.multi_reduction <add>, %100, %cst_41 [1] : vector<8x16xf32> to vector<8xf32>
    %102 = vector.shape_cast %101 : vector<8xf32> to vector<8x1xf32>
    %cst_42 = arith.constant dense<0.000000e+00> : vector<8x4xf32>
    %103 = tpu.matmul %100, %92, %cst_42 {dimension_numbers = #tpu.dot_dimension_numbers<[1], [0], [0], [1], [0, 0, 1, 1], [], []>} : vector<8x16xf32>, vector<16x4xf32>, vector<8x4xf32> -> vector<8x4xf32>
    %104 = vector.broadcast %102 : vector<8x1xf32> to vector<8x4xf32>
    %105 = arith.divf %103, %104 : vector<8x4xf32>
    %106 = vector.extract_strided_slice %5 {offsets = [0, 24], sizes = [8, 4], strides = [1, 1]} : vector<8x32xf32> to vector<8x4xf32>
    %107 = vector.extract_strided_slice %7 {offsets = [0, 24], sizes = [16, 4], strides = [1, 1]} : vector<16x32xf32> to vector<16x4xf32>
    %108 = vector.extract_strided_slice %9 {offsets = [0, 24], sizes = [16, 4], strides = [1, 1]} : vector<16x32xf32> to vector<16x4xf32>
    %cst_43 = arith.constant dense<0.000000e+00> : vector<8x16xf32>
    %109 = tpu.matmul %106, %107, %cst_43 {dimension_numbers = #tpu.dot_dimension_numbers<[1], [1], [0], [0], [0, 0, 1, 0], [], []>} : vector<8x4xf32>, vector<16x4xf32>, vector<8x16xf32> -> vector<8x16xf32>
    %cst_44 = arith.constant 5.000000e-01 : f32
    %110 = vector.broadcast %cst_44 : f32 to vector<8x16xf32>
    %111 = arith.mulf %109, %110 : vector<8x16xf32>
    %cst_45 = arith.constant dense<0xFF800000> : vector<8xf32>
    %112 = vector.multi_reduction <maximumf>, %111, %cst_45 [1] : vector<8x16xf32> to vector<8xf32>
    %113 = vector.shape_cast %112 : vector<8xf32> to vector<8x1xf32>
    %114 = vector.broadcast %113 : vector<8x1xf32> to vector<8x16xf32>
    %115 = arith.subf %111, %114 : vector<8x16xf32>
    %116 = math.exp %115 : vector<8x16xf32>
    %cst_46 = arith.constant dense<0.000000e+00> : vector<8xf32>
    %117 = vector.multi_reduction <add>, %116, %cst_46 [1] : vector<8x16xf32> to vector<8xf32>
    %118 = vector.shape_cast %117 : vector<8xf32> to vector<8x1xf32>
    %cst_47 = arith.constant dense<0.000000e+00> : vector<8x4xf32>
    %119 = tpu.matmul %116, %108, %cst_47 {dimension_numbers = #tpu.dot_dimension_numbers<[1], [0], [0], [1], [0, 0, 1, 1], [], []>} : vector<8x16xf32>, vector<16x4xf32>, vector<8x4xf32> -> vector<8x4xf32>
    %120 = vector.broadcast %118 : vector<8x1xf32> to vector<8x4xf32>
    %121 = arith.divf %119, %120 : vector<8x4xf32>
    %122 = vector.extract_strided_slice %5 {offsets = [0, 28], sizes = [8, 4], strides = [1, 1]} : vector<8x32xf32> to vector<8x4xf32>
    %123 = vector.extract_strided_slice %7 {offsets = [0, 28], sizes = [16, 4], strides = [1, 1]} : vector<16x32xf32> to vector<16x4xf32>
    %124 = vector.extract_strided_slice %9 {offsets = [0, 28], sizes = [16, 4], strides = [1, 1]} : vector<16x32xf32> to vector<16x4xf32>
    %cst_48 = arith.constant dense<0.000000e+00> : vector<8x16xf32>
    %125 = tpu.matmul %122, %123, %cst_48 {dimension_numbers = #tpu.dot_dimension_numbers<[1], [1], [0], [0], [0, 0, 1, 0], [], []>} : vector<8x4xf32>, vector<16x4xf32>, vector<8x16xf32> -> vector<8x16xf32>
    %cst_49 = arith.constant 5.000000e-01 : f32
    %126 = vector.broadcast %cst_49 : f32 to vector<8x16xf32>
    %127 = arith.mulf %125, %126 : vector<8x16xf32>
    %cst_50 = arith.constant dense<0xFF800000> : vector<8xf32>
    %128 = vector.multi_reduction <maximumf>, %127, %cst_50 [1] : vector<8x16xf32> to vector<8xf32>
    %129 = vector.shape_cast %128 : vector<8xf32> to vector<8x1xf32>
    %130 = vector.broadcast %129 : vector<8x1xf32> to vector<8x16xf32>
    %131 = arith.subf %127, %130 : vector<8x16xf32>
    %132 = math.exp %131 : vector<8x16xf32>
    %cst_51 = arith.constant dense<0.000000e+00> : vector<8xf32>
    %133 = vector.multi_reduction <add>, %132, %cst_51 [1] : vector<8x16xf32> to vector<8xf32>
    %134 = vector.shape_cast %133 : vector<8xf32> to vector<8x1xf32>
    %cst_52 = arith.constant dense<0.000000e+00> : vector<8x4xf32>
    %135 = tpu.matmul %132, %124, %cst_52 {dimension_numbers = #tpu.dot_dimension_numbers<[1], [0], [0], [1], [0, 0, 1, 1], [], []>} : vector<8x16xf32>, vector<16x4xf32>, vector<8x4xf32> -> vector<8x4xf32>
    %136 = vector.broadcast %134 : vector<8x1xf32> to vector<8x4xf32>
    %137 = arith.divf %135, %136 : vector<8x4xf32>
    %138 = tpu.concatenate %25, %41, %57, %73, %89, %105, %121, %137 in 1 : vector<8x4xf32>, vector<8x4xf32>, vector<8x4xf32>, vector<8x4xf32>, vector<8x4xf32>, vector<8x4xf32>, vector<8x4xf32>, vector<8x4xf32> -> vector<8x32xf32>
    %c0_53 = arith.constant 0 : index
    %c0_54 = arith.constant 0 : index
    %139 = vector.load %arg7[%c0_53, %c0_54] : memref<32x32xf32, #tpu.memory_space<vmem>>, vector<32x32xf32>
    %cst_55 = arith.constant dense<0.000000e+00> : vector<8x32xf32>
    %140 = tpu.matmul %138, %139, %cst_55 {dimension_numbers = #tpu.dot_dimension_numbers<[1], [0], [0], [1], [0, 0, 1, 1], [], []>} : vector<8x32xf32>, vector<32x32xf32>, vector<8x32xf32> -> vector<8x32xf32>
    %c0_56 = arith.constant 0 : index
    %c0_57 = arith.constant 0 : index
    %141 = vector.load %arg8[%c0_56, %c0_57] : memref<1x32xf32, #tpu.memory_space<vmem>>, vector<1x32xf32>
    %142 = vector.broadcast %141 : vector<1x32xf32> to vector<8x32xf32>
    %143 = arith.addf %140, %142 : vector<8x32xf32>
    %c0_58 = arith.constant 0 : index
    %c0_59 = arith.constant 0 : index
    %c0_60 = arith.constant 0 : index
    %144 = vector.load %arg9[%c0_58, %c0_59, %c0_60] : memref<1x8x32xf32, #tpu.memory_space<vmem>>, vector<1x8x32xf32>
    %145 = vector.shape_cast %144 : vector<1x8x32xf32> to vector<8x32xf32>
    %146 = vector.shape_cast %143 : vector<8x32xf32> to vector<1x8x32xf32>
    tpu.vector_store %arg9[%c0_58, %c0_59, %c0_60], %146 {strides = array<i32>} : memref<1x8x32xf32, #tpu.memory_space<vmem>>, vector<1x8x32xf32>,
    return
  }
  func.func @transform_0(%arg0: i32, %arg1: i32) -> (i32, i32, i32) {
    %c0_i32 = arith.constant 0 : i32
    %c0_i32_0 = arith.constant 0 : i32
    return %arg0, %arg1, %c0_i32 : i32, i32, i32
  }
  func.func @transform_1(%arg0: i32, %arg1: i32) -> (i32, i32, i32) {
    %c0_i32 = arith.constant 0 : i32
    %c0_i32_0 = arith.constant 0 : i32
    %c0_i32_1 = arith.constant 0 : i32
    return %arg0, %c0_i32, %c0_i32_0 : i32, i32, i32
  }
  func.func @transform_2(%arg0: i32, %arg1: i32) -> (i32, i32) {
    %c0_i32 = arith.constant 0 : i32
    %c0_i32_0 = arith.constant 0 : i32
    %c0_i32_1 = arith.constant 0 : i32
    return %c0_i32, %c0_i32_0 : i32, i32
  }
  func.func @transform_3(%arg0: i32, %arg1: i32) -> (i32, i32) {
    %c0_i32 = arith.constant 0 : i32
    %c0_i32_0 = arith.constant 0 : i32
    %c0_i32_1 = arith.constant 0 : i32
    return %c0_i32, %c0_i32_0 : i32, i32
  }
  func.func @transform_4(%arg0: i32, %arg1: i32) -> (i32, i32) {
    %c0_i32 = arith.constant 0 : i32
    %c0_i32_0 = arith.constant 0 : i32
    %c0_i32_1 = arith.constant 0 : i32
    return %c0_i32, %c0_i32_0 : i32, i32
  }
  func.func @transform_5(%arg0: i32, %arg1: i32) -> (i32, i32) {
    %c0_i32 = arith.constant 0 : i32
    %c0_i32_0 = arith.constant 0 : i32
    %c0_i32_1 = arith.constant 0 : i32
    return %c0_i32, %c0_i32_0 : i32, i32
  }
  func.func @transform_6(%arg0: i32, %arg1: i32) -> (i32, i32) {
    %c0_i32 = arith.constant 0 : i32
    %c0_i32_0 = arith.constant 0 : i32
    %c0_i32_1 = arith.constant 0 : i32
    return %c0_i32, %c0_i32_0 : i32, i32
  }
  func.func @transform_7(%arg0: i32, %arg1: i32) -> (i32, i32, i32) {
    %c0_i32 = arith.constant 0 : i32
    %c0_i32_0 = arith.constant 0 : i32
    return %arg0, %arg1, %c0_i32 : i32, i32, i32
  }
}

</mosaic_0001>

<bundles_post_ra>
// kernel: cross_attention.1
= control target key start
LH: loop header
LB: loop body
LE: loop exit
PB: predicated region body
PF: predicated region fallthrough
CT: control target
= control target key end

     0   :  { %12 = vsyncpa [#allocation3], 0  ;;  %s3210_s0 = inlined_call_operand.vmem [shape: f32[2,8,32], index: 0, kind: input, shape index: {}]   ;;  %s3211_s1 = inlined_call_operand.vmem [shape: f32[2,16,32], index: 1, kind: input, shape index: {}]   ;;  %s3212_s2 = inlined_call_operand.vmem [shape: f32[32,32], index: 2, kind: input, shape index: {}]   ;;  %s3213_s3 = inlined_call_operand.vmem [shape: f32[32,32], index: 3, kind: input, shape index: {}]   ;;  %s3214_s4 = inlined_call_operand.vmem [shape: f32[32,32], index: 4, kind: input, shape index: {}]   ;;  %s3215_s5 = inlined_call_operand.vmem [shape: f32[32,32], index: 5, kind: input, shape index: {}]   ;;  %s3216_s6 = inlined_call_operand.vmem [shape: f32[1,32], index: 6, kind: input, shape index: {}]   ;;  %s3217_s7 = inlined_call_operand.hbm [shape: f32[2,8,32], index: 7, kind: output, shape index: {}]  }
   0x1   :  { %14 = vsyncpa [#allocation3 + $0x1], 0  ;;  %s2841_s24 = smov 0   ;;  %s2843_s25 = smov 0  }
   0x2   :  { %s2845_s26 = smov 0   ;;  %s2847_s27 = smov 0  }
   0x3   :  { %s2849_s28 = smov 0   ;;  %s2851_s29 = smov 0  }
   0x4 LB: > { %s2166_s30 = sadd.s32 4294967295, %s2781_s29   ;;  %s2167_s8 = sadd.s32 4294967294, %s2781_s29   ;;  %s2781_s29 = sphi %s2851_s29, %s20_s29   ;;  %s2777_s28 = sphi %s2849_s28, %s3226_s28   ;;  %s2773_s27 = sphi %s2847_s27, %s3225_s27   ;;  %s2769_s26 = sphi %s2845_s26, %s3224_s26   ;;  %s2765_s25 = sphi %s2843_s25, %s3223_s25   ;;  %s2761_s24 = sphi %s2841_s24, %s3222_s24  }
   0x5   : > { %s32_s9 = sadd.s32 1, %s2777_s28  ;;  %s200_s10 = sadd.s32 1, %s2769_s26 }
   0x6   : > { %p34_p0 = scmp.ge.s32.totalorder %s32_s9, 2  ;;  %p210_p1 = scmp.ne.s32.totalorder %s2769_s26, %s2765_s25 }
   0x7   : > { %p211_p2 = scmp.eq.s32.totalorder %s2166_s30, 1  ;;  %p216_p3 = scmp.ne.s32.totalorder %s2765_s25, %s2761_s24 }
   0x8   : > { %s3228_s9 = smov (%p34_p0, %s32_s9), 0  ;;  %p217_p5 = scmp.eq.s32.totalorder %s2167_s8, 1 }
   0x9   : > { %p2881_p4 = por %p211_p2, %p210_p1  ;;  %s195_s12 = ssub.s32 %s2777_s28, %s3228_s9 }
   0xa   : > { %p2170_p6 = scmp.ge.s32.totalorder %s2781_s29, 1  ;;  %p198_p7 = scmp.eq.s32.totalorder %s195_s12, 0 }
   0xb   : > { %p2888_p8 = por %p217_p5, %p216_p3  ;;  %p268_p9 = scmp.lt.s32.totalorder %s2781_s29, 3 }
   0xc   : > { %s2894_s14 = scalar_select %p198_p7, %s2769_s26, %s200_s10  }
   0xd   : > { %p269_p10 = pnand %p2170_p6, %p268_p9 }
   0xe   : > { %v400_v0 = vld [vmem:[%s3213_s3] sm:$0xff] (!%p269_p10)  ;;  %v401_v1 = vld [vmem:[%s3213_s3 + $0x8] sm:$0xff] (!%p269_p10)  ;;  %v402_v2 = vld [vmem:[%s3213_s3 + $0x10] sm:$0xff] (!%p269_p10)  ;;  %p307_p11 = scmp.lt.s32.totalorder (!%p269_p10), %s2773_s27, 1  ;;  %v2783_v5 = vmov (!%p269_p10), 0.0|0.0   ;;  %vm2784_vm0 = vmmov (!%p269_p10), 0  }
   0xf   : > { %272 = sbr.rel (%p269_p10) target bundleno = 3840 (0xf00), region = 48  ;;  %v2451_v3 = vpack.c.bf16 (!%p269_p10), %v401_v1, %v400_v0  ;;  %v403_v4 = vld [vmem:[%s3213_s3 + $0x18] sm:$0xff] (!%p269_p10)  ;;  %2445 = vmatprep.subr.bf16.mxu0 (!%p269_p10), %v2783_v5  ;;  %v322_v6 = vld [vmem:[%s3212_s2] sm:$0xff] (!%p269_p10)  ;;  %v323_v7 = vld [vmem:[%s3212_s2 + $0x8] sm:$0xff] (!%p269_p10)  ;;  %v2785_v12 = vmov (!%p269_p10), 0.0   ;;  %vm326_vm1 = vcmask (!%p269_p10), 261120  }
  0x10   : > { %v2455_v8 = vpack.c.bf16 (!%p269_p10), %v403_v4, %v402_v2  ;;  %v2446_v9 = vpack.c.bf16 (!%p269_p10), %v323_v7, %v322_v6  ;;  %v324_v10 = vld [vmem:[%s3212_s2 + $0x10] sm:$0xff] (!%p269_p10)  ;;  %v325_v11 = vld [vmem:[%s3212_s2 + $0x18] sm:$0xff] (!%p269_p10)  ;;  %2297 = vmatprep.mubr.msk.f32.mxu0 (!%p269_p10), %vm2784_vm0, %v2785_v12  ;;  %v485_v17 = vld [vmem:[%s3214_s4] sm:$0xff] (!%p269_p10)  ;;  %vm564_vm2 = vcmask (!%p269_p10), 31744   ;;  %s2786_s22 = smov (!%p269_p10), 124   ;;  %vm645_vm4 = vcmask (!%p269_p10), 130048  }
  0x11   : > { %2452 = vmatprep.subr.bf16.mxu1 (!%p269_p10), %v2451_v3  ;;  %v2449_v13 = vpack.c.bf16 (!%p269_p10), %v325_v11, %v324_v10  ;;  %v486_v18 = vld [vmem:[%s3214_s4 + $0x8] sm:$0xff] (!%p269_p10)  ;;  %v487_v19 = vld [vmem:[%s3214_s4 + $0x10] sm:$0xff] (!%p269_p10)  ;;  %v488_v21 = vld [vmem:[%s3214_s4 + $0x18] sm:$0xff] (!%p269_p10)  ;;  %s2788_s30 = smov (!%p269_p10), 116   ;;  %s2789_s8 = smov (!%p269_p10), 112   ;;  %vm1972_vm5 = vcmask (!%p269_p10), 64512  }
  0x12   : > { %2454 = vmatpush3.bf16.msra.mxu1 (!%p269_p10), %v2451_v3  ;;  %2447 = vmatpush3.bf16.msra.mxu0 (!%p269_p10), %v2446_v9  ;;  %v2459_v20 = vpack.c.bf16 (!%p269_p10), %v486_v18, %v485_v17  ;;  %v2463_v22 = vpack.c.bf16 (!%p269_p10), %v488_v21, %v487_v19  ;;  %vm2959_vm3 = vmpackc.low (!%p269_p10), %vm564_vm2, %vm564_vm2  ;;  %s2792_s15 = smov (!%p269_p10), 100   ;;  %s2793_s16 = smov (!%p269_p10), 8   ;;  %vm1974_vm6 = vcmask (!%p269_p10), 97280   ;;  %vm1977_vm7 = vcmask (!%p269_p10), 162816  }
  0x13   : > { %2456 = vmatprep.subr.bf16.mxu1 (!%p269_p10), %v2455_v8  ;;  %2448 = vmatprep.subr.bf16.mxu0 (!%p269_p10), %v2783_v5  ;;  %s2794_s17 = smov (!%p269_p10), 20   ;;  %s2795_s18 = smov (!%p269_p10), 4   ;;  %vm1979_vm8 = vcmask (!%p269_p10), 195584   ;;  %vm1981_vm9 = vcmask (!%p269_p10), 228352  }
  0x14   : > { %s2798_s21 = smov (!%p269_p10), 24  }
  0x16   : > { %s308_s12 = scalar_select %p307_p11, %s2773_s27, 1  ;;  %2458 = vmatpush3.bf16.msra.mxu1 %v2455_v8  ;;  %2450 = vmatpush3.bf16.msra.mxu0 %v2449_v13 }
  0x17   : > { %2467 = vmatprep.subr.bf16.mxu1 %v2783_v5  ;;  %2460 = vmatprep.subr.bf16.mxu0 %v2459_v20 }
  0x18   : > { %s2218_s19 = sshll.u32 %s308_s12, 4  ;;  %s2172_s20 = sshll.u32 %s308_s12, 3 }
  0x19   : > { %s318_s23 = scalar_lea.vmem %s3211_s1, %s2218_s19  ;;  %s313_s10 = scalar_lea.vmem %s3210_s0, %s2172_s20 }
  0x1a   : > { %v320_v14 = vld [vmem:[%s318_s23] sm:$0xff]  ;;  %v321_v15 = vld [vmem:[%s318_s23 + $0x8] sm:$0xff]  ;;  %s2787_s23 = smov 120   ;;  %s2791_s12 = smov 104  }
  0x1b   : > { %2308 = vmatprep.mubr.msk.f32.mxu1 %vm326_vm1, %v320_v14  ;;  %v319_v16 = vld [vmem:[%s313_s10] sm:$0xff]  ;;  %s2790_s10 = smov 108   ;;  %s2796_s19 = smov 12  }
  0x1c   : > { %2309 = vmatmul.mubr.msk.f32.vlgmr.msra.gmra.mrb[0].mxu1 %vm326_vm1, %v321_v15  ;;  %2298 = vmatmul.mubr.msk.f32.vlgmr.msra.gmra.mrb[0].mxu0 %vm326_vm1, %v319_v16  ;;  %s2797_s20 = smov 16  }
  0x1d   : > { %2326 = vmatprep.mubr.msk.f32.mxu1 %vm2784_vm0, %v2785_v12  ;;  %2319 = vmatprep.mubr.msk.f32.mxu0 %vm326_vm1, %v320_v14 }
  0x1e   : > { %2462 = vmatpush3.bf16.msra.mxu0 %v2459_v20 }
  0x1f   : > { %2464 = vmatprep.subr.bf16.mxu0 %v2463_v22 }
  0x22   : > { %2466 = vmatpush3.bf16.msra.mxu0 %v2463_v22 }
  0x23   : > { %2478 = vmatprep.subr.bf16.mxu0 %v2783_v5 }
  0x25   : > { %2320 = vmatmul.mubr.msk.f32.vlgmr.msra.gmra.mrb[2].mxu0 %vm326_vm1, %v321_v15 }
  0x26   : > { %2347 = vmatprep.mubr.msk.f32.mxu0 %vm2784_vm0, %v2785_v12 }
  0xef   : > { %v2310_v23 = vpop.f32.mrb[0].mxu1  ;;  %v2955_v24 = vpop.f32.mrb[0].mxu0 }
  0xf0   : > { %v476_v25 = vpop.f32.mrb[1].mxu1  ;;  %v2299_v27 = vpop.f32.mrb[1].mxu0  ;;  %730 = vrot.lane.b32.xlu1 %v2955_v24, %s2786_s22 }
  0xf1   : > { %v2468_v28 = vpack.c.bf16 %v2310_v23, %v476_v25  ;;  %v2964_v29 = vpack.i.bf16 %v2310_v23, %v476_v25 }
  0xf3   : > { %2470 = vmatpush3.bf16.xpose.msk.msra.mxu1 %vm2959_vm3, %v2468_v28 }
  0xf4   : > { %2471 = vmatprep.subr.bf16.mxu1 %v2783_v5 }
  0xf8   : > { %v2321_v30 = vpop.f32.mrb[2].mxu0 }
  0xf9   : > { %v555_v31 = vpop.f32.mrb[3].mxu0 }
  0xfa   : > { %2327 = vmatmul.mubr.msk.f32.vlgmr.msra.gmra.mrb[2].mxu1 %vm564_vm2, %v2955_v24  ;;  %v2973_v32 = vpack.i.bf16 %v2321_v30, %v555_v31  ;;  %v2472_v37 = vpack.c.bf16 %v2321_v30, %v555_v31 }
  0xfb   : > { %2333 = vmatprep.mubr.msk.f32.mxu1 %vm2784_vm0, %v2785_v12 }
  0xfc   : > { %2473 = vmatpush3.bf16.msra.mxu1 %v2472_v37 }
  0xfd   : > { %2474 = vmatprep.subr.bf16.mxu1 %v2783_v5 }
 0x162   : > { %v731_v50 = vpop.permute.xlu1 %730 }
 0x1cd   : > { %v640_v33 = vpop.f32.mrb[2].mxu1 }
 0x1ce   : > { %v644_v34 = vmul.f32 0.5, %v640_v33  ;;  %v2328_v35 = vpop.f32.mrb[3].mxu1 }
 0x1d0   : > { %v646_v36 = vsel %vm645_vm4, %v644_v34, -inf }
 0x1d1   : > { %647 = vmax.xlane.f32.xlu0 %v646_v36 }
 0x1e7   : > { %2602 = vrot.lane.b32.xlu0 %v2964_v29, %s2786_s22 }
 0x1eb   : > { %2607 = vrot.lane.b32.xlu0 %v2973_v32, %s2786_s22  ;;  %s2215_s22 = sshll.u32 %s2773_s27, 7  ;;  %s2800_s27 = smov [#allocation2]  }
 0x1ef   : > { %2612 = vrot.lane.b32.xlu0 %v2964_v29, %s2787_s23 }
 0x1f3   : > { %905 = vrot.lane.b32.xlu0 %v2955_v24, %s2787_s23 }
 0x25e   : > { %v648_v38 = vpop.xlane.xlu0 %647 }
 0x25f   : > { %v649_v39 = vsub.f32 %v644_v34, %v648_v38 }
 0x261   : > { %v650_v40 = vmul.f32 1.442695, %v649_v39 }
 0x262   : > { %v2603_v41 = vpop.permute.xlu0 %2602 }
 0x263   : > { %2671 = vpow2.f32 %v650_v40  ;;  %v2605_v45 = vunpack.i.h.bf16 %v2603_v41  ;;  %v2604_v46 = vunpack.i.l.bf16 %v2603_v41 }
 0x265   : > { %v2475_v49 = vpack.c.bf16 %v2605_v45, %v2604_v46 }
 0x266   : > { %v2608_v42 = vpop.permute.xlu0 %2607 }
 0x267   : > { %v2610_v43 = vunpack.i.h.bf16 %v2608_v42  ;;  %v2609_v44 = vunpack.i.l.bf16 %v2608_v42 }
 0x269   : > { %v2479_v47 = vpack.c.bf16 %v2610_v43, %v2609_v44 }
 0x26a   : > { %v2613_v0 = vpop.permute.xlu0 %2612 }
 0x26b   : > { %2480 = vmatpush3.bf16.msra.mxu0 %v2479_v47  ;;  %v2615_v1 = vunpack.i.h.bf16 %v2613_v0  ;;  %v2614_v2 = vunpack.i.l.bf16 %v2613_v0 }
 0x26c   : > { %2481 = vmatprep.subr.bf16.mxu0 %v2783_v5 }
 0x26d   : > { %v2984_v48 = vpop.eup %2671  ;;  %v2482_v4 = vpack.c.bf16 %v2615_v1, %v2614_v2 }
 0x26e   : > { %2334 = vmatmul.mubr.msk.f32.vlgmr.msra.gmra.mrb[4].mxu1 %vm645_vm4, %v2984_v48  ;;  %v906_v6 = vpop.permute.xlu0 %905 }
 0x26f   : > { %2477 = vmatpush3.bf16.xpose.msk.msra.mxu1 %vm2959_vm3, %v2475_v49  ;;  %2340 = vmatprep.mubr.msk.f32.mxu1 %vm2784_vm0, %v2785_v12 }
 0x270   : > { %2485 = vmatprep.subr.bf16.mxu1 %v2783_v5 }
 0x276   : > { %2341 = vmatmul.mubr.msk.f32.vlgmr.msra.gmra.mrb[6].mxu1 %vm564_vm2, %v731_v50 }
 0x277   : > { %2361 = vmatprep.mubr.msk.f32.mxu1 %vm2784_vm0, %v2785_v12 }
 0x341   : > { %v2996_v51 = vpop.f32.mrb[4].mxu1 }
 0x342   : > { %v2335_v52 = vpop.f32.mrb[5].mxu1 }
 0x349   : > { %v808_v53 = vpop.f32.mrb[6].mxu1 }
 0x34a   : > { %v812_v54 = vmul.f32 0.5, %v808_v53  ;;  %v2342_v55 = vpop.f32.mrb[7].mxu1 }
 0x34c   : > { %v813_v56 = vsel %vm645_vm4, %v812_v54, -inf }
 0x34d   : > { %814 = vmax.xlane.f32.xlu1 %v813_v56 }
 0x35e   : > { %2617 = vrot.lane.b32.xlu1 %v2973_v32, %s2787_s23 }
 0x362   : > { %2622 = vrot.lane.b32.xlu1 %v2964_v29, %s2788_s30 }
 0x366   : > { %1078 = vrot.lane.b32.xlu1 %v2955_v24, %s2788_s30 }
 0x3da   : > { %v815_v57 = vpop.xlane.xlu1 %814 }
 0x3db   : > { %v816_v58 = vsub.f32 %v812_v54, %v815_v57 }
 0x3dd   : > { %v817_v59 = vmul.f32 1.442695, %v816_v58 }
 0x3de   : > { %v2618_v60 = vpop.permute.xlu1 %2617 }
 0x3df   : > { %2673 = vpow2.f32 %v817_v59  ;;  %v2620_v61 = vunpack.i.h.bf16 %v2618_v60  ;;  %v2619_v62 = vunpack.i.l.bf16 %v2618_v60 }
 0x3e1   : > { %v2486_v63 = vpack.c.bf16 %v2620_v61, %v2619_v62 }
 0x3e2   : > { %v2623_v21 = vpop.permute.xlu1 %2622 }
 0x3e3   : > { %2487 = vmatpush3.bf16.msra.mxu1 %v2486_v63  ;;  %v2625_v22 = vunpack.i.h.bf16 %v2623_v21  ;;  %v2624_v23 = vunpack.i.l.bf16 %v2623_v21 }
 0x3e4   : > { %2488 = vmatprep.subr.bf16.mxu1 %v2783_v5 }
 0x3e5   : > { %v2489_v27 = vpack.c.bf16 %v2625_v22, %v2624_v23 }
 0x3e6   : > { %v1079_v28 = vpop.permute.xlu1 %1078 }
 0x3e9   : > { %v3006_v3 = vpop.eup %2673 }
 0x3ea   : > { %2348 = vmatmul.mubr.msk.f32.vlgmr.msra.gmra.mrb[4].mxu0 %vm645_vm4, %v3006_v3 }
 0x3eb   : > { %2484 = vmatpush3.bf16.xpose.msk.msra.mxu0 %vm2959_vm3, %v2482_v4  ;;  %2354 = vmatprep.mubr.msk.f32.mxu0 %vm2784_vm0, %v2785_v12 }
 0x3ec   : > { %2492 = vmatprep.subr.bf16.mxu0 %v2783_v5 }
 0x3f2   : > { %2355 = vmatmul.mubr.msk.f32.vlgmr.msra.gmra.mrb[6].mxu0 %vm564_vm2, %v906_v6 }
 0x3f3   : > { %2375 = vmatprep.mubr.msk.f32.mxu0 %vm2784_vm0, %v2785_v12 }
 0x4bd   : > { %v3018_v7 = vpop.f32.mrb[4].mxu0 }
 0x4be   : > { %v2349_v8 = vpop.f32.mrb[5].mxu0 }
 0x4c5   : > { %v983_v9 = vpop.f32.mrb[6].mxu0 }
 0x4c6   : > { %v987_v10 = vmul.f32 0.5, %v983_v9  ;;  %v2356_v11 = vpop.f32.mrb[7].mxu0 }
 0x4c8   : > { %v988_v13 = vsel %vm645_vm4, %v987_v10, -inf }
 0x4c9   : > { %989 = vmax.xlane.f32.xlu0 %v988_v13 }
 0x4df   : > { %2627 = vrot.lane.b32.xlu0 %v2973_v32, %s2788_s30 }
 0x4e3   : > { %2632 = vrot.lane.b32.xlu0 %v2964_v29, %s2789_s8 }
 0x4e7   : > { %1251 = vrot.lane.b32.xlu0 %v2955_v24, %s2789_s8 }
 0x556   : > { %v990_v14 = vpop.xlane.xlu0 %989 }
 0x557   : > { %v991_v15 = vsub.f32 %v987_v10, %v990_v14 }
 0x559   : > { %v992_v16 = vmul.f32 1.442695, %v991_v15 }
 0x55a   : > { %v2628_v17 = vpop.permute.xlu0 %2627 }
 0x55b   : > { %2675 = vpow2.f32 %v992_v16  ;;  %v2630_v18 = vunpack.i.h.bf16 %v2628_v17  ;;  %v2629_v19 = vunpack.i.l.bf16 %v2628_v17 }
 0x55d   : > { %v2493_v20 = vpack.c.bf16 %v2630_v18, %v2629_v19 }
 0x55e   : > { %v2633_v44 = vpop.permute.xlu0 %2632 }
 0x55f   : > { %2494 = vmatpush3.bf16.msra.mxu0 %v2493_v20  ;;  %v2635_v45 = vunpack.i.h.bf16 %v2633_v44  ;;  %v2634_v46 = vunpack.i.l.bf16 %v2633_v44 }
 0x560   : > { %2495 = vmatprep.subr.bf16.mxu0 %v2783_v5 }
 0x561   : > { %v2496_v49 = vpack.c.bf16 %v2635_v45, %v2634_v46 }
 0x562   : > { %v1252_v50 = vpop.permute.xlu0 %1251 }
 0x565   : > { %v3028_v25 = vpop.eup %2675 }
 0x566   : > { %2362 = vmatmul.mubr.msk.f32.vlgmr.msra.gmra.mrb[8].mxu1 %vm645_vm4, %v3028_v25 }
 0x567   : > { %2491 = vmatpush3.bf16.xpose.msk.msra.mxu1 %vm2959_vm3, %v2489_v27  ;;  %2368 = vmatprep.mubr.msk.f32.mxu1 %vm2784_vm0, %v2785_v12 }
 0x568   : > { %2499 = vmatprep.subr.bf16.mxu1 %v2783_v5 }
 0x56e   : > { %2369 = vmatmul.mubr.msk.f32.vlgmr.msra.gmra.mrb[10].mxu1 %vm564_vm2, %v1079_v28 }
 0x56f   : > { %2389 = vmatprep.mubr.msk.f32.mxu1 %vm2784_vm0, %v2785_v12 }
 0x639   : > { %v3040_v30 = vpop.f32.mrb[8].mxu1 }
 0x63a   : > { %v2363_v31 = vpop.f32.mrb[9].mxu1 }
 0x641   : > { %v1156_v33 = vpop.f32.mrb[10].mxu1 }
 0x642   : > { %v1160_v34 = vmul.f32 0.5, %v1156_v33  ;;  %v2370_v35 = vpop.f32.mrb[11].mxu1 }
 0x644   : > { %v1161_v36 = vsel %vm645_vm4, %v1160_v34, -inf }
 0x645   : > { %1162 = vmax.xlane.f32.xlu1 %v1161_v36 }
 0x656   : > { %2637 = vrot.lane.b32.xlu1 %v2973_v32, %s2789_s8 }
 0x65a   : > { %2642 = vrot.lane.b32.xlu1 %v2964_v29, %s2790_s10 }
 0x65e   : > { %1424 = vrot.lane.b32.xlu1 %v2955_v24, %s2790_s10 }
 0x6d2   : > { %v1163_v37 = vpop.xlane.xlu1 %1162 }
 0x6d3   : > { %v1164_v38 = vsub.f32 %v1160_v34, %v1163_v37 }
 0x6d5   : > { %v1165_v39 = vmul.f32 1.442695, %v1164_v38 }
 0x6d6   : > { %v2638_v40 = vpop.permute.xlu1 %2637 }
 0x6d7   : > { %2677 = vpow2.f32 %v1165_v39  ;;  %v2640_v41 = vunpack.i.h.bf16 %v2638_v40  ;;  %v2639_v42 = vunpack.i.l.bf16 %v2638_v40  ;;  %v819_v40 = vsel %vm645_vm4, %v3006_v3, 0.0 }
 0x6d9   : > { %v2500_v43 = vpack.c.bf16 %v2640_v41, %v2639_v42  ;;  %v652_v41 = vsel %vm645_vm4, %v2984_v48, 0.0 }
 0x6da   : > { %v2643_v1 = vpop.permute.xlu1 %2642 }
 0x6db   : > { %2501 = vmatpush3.bf16.msra.mxu1 %v2500_v43  ;;  %v2645_v2 = vunpack.i.h.bf16 %v2643_v1  ;;  %v2644_v4 = vunpack.i.l.bf16 %v2643_v1 }
 0x6dc   : > { %2502 = vmatprep.subr.bf16.mxu1 %v2783_v5 }
 0x6dd   : > { %v2503_v8 = vpack.c.bf16 %v2645_v2, %v2644_v4 }
 0x6de   : > { %v1425_v9 = vpop.permute.xlu1 %1424 }
 0x6e1   : > { %v3050_v47 = vpop.eup %2677 }
 0x6e2   : > { %2376 = vmatmul.mubr.msk.f32.vlgmr.msra.gmra.mrb[8].mxu0 %vm645_vm4, %v3050_v47  ;;  %v1167_v26 = vsel %vm645_vm4, %v3050_v47, 0.0 }
 0x6e3   : > { %2498 = vmatpush3.bf16.xpose.msk.msra.mxu0 %vm2959_vm3, %v2496_v49  ;;  %2382 = vmatprep.mubr.msk.f32.mxu0 %vm2784_vm0, %v2785_v12 }
 0x6e4   : > { %2506 = vmatprep.subr.bf16.mxu0 %v2783_v5 }
 0x6ea   : > { %2383 = vmatmul.mubr.msk.f32.vlgmr.msra.gmra.mrb[10].mxu0 %vm564_vm2, %v1252_v50 }
 0x6eb   : > { %2403 = vmatprep.mubr.msk.f32.mxu0 %vm2784_vm0, %v2785_v12 }
 0x7b5   : > { %v3062_v52 = vpop.f32.mrb[8].mxu0 }
 0x7b6   : > { %v2377_v53 = vpop.f32.mrb[9].mxu0 }
 0x7bd   : > { %v1329_v54 = vpop.f32.mrb[10].mxu0 }
 0x7be   : > { %v1333_v55 = vmul.f32 0.5, %v1329_v54  ;;  %v2384_v56 = vpop.f32.mrb[11].mxu0 }
 0x7c0   : > { %v1334_v57 = vsel %vm645_vm4, %v1333_v55, -inf }
 0x7c1   : > { %1335 = vmax.xlane.f32.xlu0 %v1334_v57 }
 0x7d7   : > { %2647 = vrot.lane.b32.xlu0 %v2973_v32, %s2790_s10 }
 0x7db   : > { %2652 = vrot.lane.b32.xlu0 %v2964_v29, %s2791_s12 }
 0x7df   : > { %1597 = vrot.lane.b32.xlu0 %v2955_v24, %s2791_s12 }
 0x84e   : > { %v1336_v58 = vpop.xlane.xlu0 %1335 }
 0x84f   : > { %v1337_v59 = vsub.f32 %v1333_v55, %v1336_v58 }
 0x851   : > { %v1338_v60 = vmul.f32 1.442695, %v1337_v59 }
 0x852   : > { %v2648_v61 = vpop.permute.xlu0 %2647 }
 0x853   : > { %2679 = vpow2.f32 %v1338_v60  ;;  %v2650_v62 = vunpack.i.h.bf16 %v2648_v61  ;;  %v2649_v63 = vunpack.i.l.bf16 %v2648_v61 }
 0x855   : > { %v2507_v0 = vpack.c.bf16 %v2650_v62, %v2649_v63  ;;  %v994_v62 = vsel %vm645_vm4, %v3028_v25, 0.0 }
 0x856   : > { %v2653_v27 = vpop.permute.xlu0 %2652 }
 0x857   : > { %2508 = vmatpush3.bf16.msra.mxu0 %v2507_v0  ;;  %v2655_v28 = vunpack.i.h.bf16 %v2653_v27  ;;  %v2654_v31 = vunpack.i.l.bf16 %v2653_v27 }
 0x858   : > { %2509 = vmatprep.subr.bf16.mxu0 %v2783_v5 }
 0x859   : > { %v2510_v34 = vpack.c.bf16 %v2655_v28, %v2654_v31  ;;  %v1984_v31 = vld [vmem:[%s3215_s5 + $0x8] sm:$0xff] }
 0x85d   : > { %v3072_v6 = vpop.eup %2679 }
 0x85e   : > { %2390 = vmatmul.mubr.msk.f32.vlgmr.msra.gmra.mrb[12].mxu1 %vm645_vm4, %v3072_v6  ;;  %v1340_v63 = vsel %vm645_vm4, %v3072_v6, 0.0 }
 0x85f   : > { %2505 = vmatpush3.bf16.xpose.msk.msra.mxu1 %vm2959_vm3, %v2503_v8  ;;  %2396 = vmatprep.mubr.msk.f32.mxu1 %vm2784_vm0, %v2785_v12 }
 0x860   : > { %2513 = vmatprep.subr.bf16.mxu1 %v2783_v5 }
 0x866   : > { %2397 = vmatmul.mubr.msk.f32.vlgmr.msra.gmra.mrb[14].mxu1 %vm564_vm2, %v1425_v9 }
 0x867   : > { %2417 = vmatprep.mubr.msk.f32.mxu1 %vm2784_vm0, %v2785_v12 }
 0x931   : > { %v3084_v10 = vpop.f32.mrb[12].mxu1 }
 0x932   : > { %v2391_v11 = vpop.f32.mrb[13].mxu1 }
 0x939   : > { %v1502_v13 = vpop.f32.mrb[14].mxu1 }
 0x93a   : > { %v1506_v14 = vmul.f32 0.5, %v1502_v13  ;;  %v2398_v15 = vpop.f32.mrb[15].mxu1 }
 0x93c   : > { %v1507_v16 = vsel %vm645_vm4, %v1506_v14, -inf }
 0x93d   : > { %1508 = vmax.xlane.f32.xlu1 %v1507_v16 }
 0x94e   : > { %2657 = vrot.lane.b32.xlu1 %v2973_v32, %s2791_s12  ;;  %s3162_s12 = scalar_lea.hbm %s3217_s7, %s2215_s22 }
 0x952   : > { %2662 = vrot.lane.b32.xlu1 %v2964_v29, %s2792_s15 }
 0x956   : > { %1770 = vrot.lane.b32.xlu1 %v2955_v24, %s2792_s15  ;;  %v1598_v24 = vpop.permute.xlu0 %1597 }
 0x9ca   : > { %v1509_v17 = vpop.xlane.xlu1 %1508 }
 0x9cb   : > { %v1510_v18 = vsub.f32 %v1506_v14, %v1509_v17 }
 0x9cd   : > { %v1511_v19 = vmul.f32 1.442695, %v1510_v18 }
 0x9ce   : > { %v2658_v20 = vpop.permute.xlu1 %2657 }
 0x9cf   : > { %2681 = vpow2.f32 %v1511_v19  ;;  %v2660_v21 = vunpack.i.h.bf16 %v2658_v20  ;;  %v2659_v22 = vunpack.i.l.bf16 %v2658_v20 }
 0x9d1   : > { %v2514_v23 = vpack.c.bf16 %v2660_v21, %v2659_v22 }
 0x9d2   : > { %v2663_v53 = vpop.permute.xlu1 %2662 }
 0x9d3   : > { %2515 = vmatpush3.bf16.msra.mxu1 %v2514_v23  ;;  %v2664_v54 = vunpack.i.l.bf16 %v2663_v53 }
 0x9d4   : > { %2516 = vmatprep.subr.bf16.mxu1 %v2783_v5 }
 0x9d6   : > { %v1771_v48 = vpop.permute.xlu1 %1770 }
 0x9d9   : > { %v2682_v33 = vpop.eup %2681 }
 0x9da   : > { %2404 = vmatmul.mubr.msk.f32.vlgmr.msra.gmra.mrb[12].mxu0 %vm645_vm4, %v2682_v33  ;;  %v1513_v0 = vsel %vm645_vm4, %v2682_v33, 0.0 }
 0x9db   : > { %2512 = vmatpush3.bf16.xpose.msk.msra.mxu0 %vm2959_vm3, %v2510_v34  ;;  %2410 = vmatprep.mubr.msk.f32.mxu0 %vm2784_vm0, %v2785_v12 }
 0x9dc   : > { %2520 = vmatprep.subr.bf16.mxu0 %v2783_v5 }
 0x9e2   : > { %2411 = vmatmul.mubr.msk.f32.vlgmr.msra.gmra.mrb[14].mxu0 %vm564_vm2, %v1598_v24 }
 0x9e3   : > { %2431 = vmatprep.mubr.msk.f32.mxu0 %vm2784_vm0, %v2785_v12 }
 0xaad   : > { %v3103_v29 = vpop.f32.mrb[12].mxu0 }
 0xaae   : > { %v2405_v35 = vpop.f32.mrb[13].mxu0 }
 0xab5   : > { %v1675_v36 = vpop.f32.mrb[14].mxu0 }
 0xab6   : > { %v1679_v37 = vmul.f32 0.5, %v1675_v36  ;;  %v2412_v38 = vpop.f32.mrb[15].mxu0 }
 0xab8   : > { %v1680_v39 = vsel %vm645_vm4, %v1679_v37, -inf }
 0xab9   : > { %1681 = vmax.xlane.f32.xlu0 %v1680_v39 }
 0xacf   : > { %2667 = vrot.lane.b32.xlu0 %v2973_v32, %s2792_s15  ;;  %v2665_v32 = vunpack.i.h.bf16 %v2663_v53 }
 0xad1   : > { %v2517_v55 = vpack.c.bf16 %v2665_v32, %v2664_v54 }
 0xaee   : > { %820 = vadd.xlane.f32.xlu0 %v819_v40 }
 0xaf2   : > { %653 = vadd.xlane.f32.xlu0 %v652_v41 }
 0xb46   : > { %v1682_v42 = vpop.xlane.xlu0 %1681 }
 0xb47   : > { %v1683_v43 = vsub.f32 %v1679_v37, %v1682_v42 }
 0xb49   : > { %v1684_v44 = vmul.f32 1.442695, %v1683_v43 }
 0xb4a   : > { %v2668_v45 = vpop.permute.xlu0 %2667 }
 0xb4b   : > { %2683 = vpow2.f32 %v1684_v44  ;;  %v2670_v46 = vunpack.i.h.bf16 %v2668_v45  ;;  %v2669_v49 = vunpack.i.l.bf16 %v2668_v45 }
 0xb4d   : > { %v2521_v50 = vpack.c.bf16 %v2670_v46, %v2669_v49 }
 0xb4f   : > { %2522 = vmatpush3.bf16.msra.mxu0 %v2521_v50 }
 0xb50   : > { %2523 = vmatprep.subr.bf16.mxu0 %v2783_v5 }
 0xb55   : > { %v2684_v3 = vpop.eup %2683 }
 0xb56   : > { %2418 = vmatmul.mubr.msk.f32.vlgmr.msra.gmra.mrb[16].mxu1 %vm645_vm4, %v2684_v3  ;;  %v1686_v1 = vsel %vm645_vm4, %v2684_v3, 0.0 }
 0xb57   : > { %2519 = vmatpush3.bf16.xpose.msk.msra.mxu1 %vm2959_vm3, %v2517_v55  ;;  %2424 = vmatprep.mubr.msk.f32.mxu1 %vm2784_vm0, %v2785_v12  ;;  %v2212_v55 = vld [vmem:[%s3216_s6] ss:$0 sm:$0xff] }
 0xb5e   : > { %2425 = vmatmul.mubr.msk.f32.vlgmr.msra.gmra.mrb[18].mxu1 %vm564_vm2, %v1771_v48 }
 0xb7b   : > { %v821_v14 = vpop.xlane.xlu0 %820 }
 0xb7f   : > { %v654_v38 = vpop.xlane.xlu0 %653 }
 0xc29   : > { %v1764_v56 = vpop.f32.mrb[16].mxu1 }
 0xc2a   : > { %v2419_v57 = vpop.f32.mrb[17].mxu1 }
 0xc31   : > { %v1848_v58 = vpop.f32.mrb[18].mxu1 }
 0xc32   : > { %v1852_v59 = vmul.f32 0.5, %v1848_v58  ;;  %v2426_v60 = vpop.f32.mrb[19].mxu1 }
 0xc34   : > { %v1853_v61 = vsel %vm645_vm4, %v1852_v59, -inf }
 0xc35   : > { %1854 = vmax.xlane.f32.xlu1 %v1853_v61 }
 0xc39   : > { %995 = vadd.xlane.f32.xlu1 %v994_v62 }
 0xc3d   : > { %1168 = vadd.xlane.f32.xlu1 %v1167_v26 }
 0xc41   : > { %1341 = vadd.xlane.f32.xlu1 %v1340_v63 }
 0xc45   : > { %1514 = vadd.xlane.f32.xlu1 %v1513_v0 }
 0xc49   : > { %1687 = vadd.xlane.f32.xlu1 %v1686_v1 }
 0xcc2   : > { %v1855_v2 = vpop.xlane.xlu1 %1854 }
 0xcc3   : > { %v1856_v4 = vsub.f32 %v1852_v59, %v1855_v2 }
 0xcc5   : > { %v1857_v8 = vmul.f32 1.442695, %v1856_v4 }
 0xcc6   : > { %v996_v9 = vpop.xlane.xlu1 %995 }
 0xcc7   : > { %2685 = vpow2.f32 %v1857_v8 }
 0xcc8   : > { %2687 = vrcp.f32 %v996_v9 }
 0xcca   : > { %v1169_v25 = vpop.xlane.xlu1 %1168 }
 0xcce   : > { %v1342_v11 = vpop.xlane.xlu1 %1341 }
 0xcd1   : > { %v2686_v47 = vpop.eup %2685 }
 0xcd2   : > { %v2688_v13 = vpop.eup %2687  ;;  %2432 = vmatmul.mubr.msk.f32.vlgmr.msra.gmra.mrb[16].mxu0 %vm645_vm4, %v2686_v47  ;;  %v1515_v6 = vpop.xlane.xlu1 %1514  ;;  %v1859_v15 = vsel %vm645_vm4, %v2686_v47, 0.0 }
 0xcd3   : > { %2689 = vrcp.f32 %v1515_v6  ;;  %1860 = vadd.xlane.f32.xlu1 %v1859_v15  ;;  %v1077_v16 = vmul.f32 %v2688_v13, %v3040_v30  ;;  %2442 = vmatprep.mubr.msk.f32.mxu0 %vm2784_vm0, %v2785_v12 }
 0xcd4   : > { %2691 = vrcp.f32 %v821_v14 }
 0xcd5   : > { %1948 = vrot.lane.b32.xlu0 %v1077_v16, %s2793_s16  ;;  %2693 = vrcp.f32 %v1169_v25 }
 0xcd6   : > { %2695 = vrcp.f32 %v1342_v11  ;;  %v1688_v18 = vpop.xlane.xlu1 %1687 }
 0xcd7   : > { %2697 = vrcp.f32 %v1688_v18 }
 0xcdd   : > { %v2690_v17 = vpop.eup %2689 }
 0xcde   : > { %v1596_v19 = vmul.f32 %v2690_v17, %v3103_v29  ;;  %v2692_v20 = vpop.eup %2691 }
 0xcdf   : > { %v904_v21 = vmul.f32 %v2692_v20, %v3018_v7  ;;  %v2694_v22 = vpop.eup %2693  ;;  %v1983_v7 = vld [vmem:[%s3215_s5] sm:$0xff] }
 0xce0   : > { %1960 = vrot.lane.b32.xlu0 %v1596_v19, %s2794_s17  ;;  %v1250_v12 = vmul.f32 %v2694_v22, %v3062_v52  ;;  %v2696_v30 = vpop.eup %2695  ;;  %v1985_v52 = vld [vmem:[%s3215_s5 + $0x10] sm:$0xff]  ;;  %v2524_v33 = vpack.c.bf16 %v1984_v31, %v1983_v7  ;;  %s2799_s17 = smov 28  }
 0xce1   : > { %v1423_v23 = vmul.f32 %v2696_v30, %v3084_v10  ;;  %v2698_v27 = vpop.eup %2697  ;;  %v1986_v10 = vld [vmem:[%s3215_s5 + $0x18] sm:$0xff] }
 0xce2   : > { %v1769_v28 = vmul.f32 %v2698_v27, %v1764_v56  ;;  %2525 = vmatpush3.bf16.msra.mxu0 %v2524_v33  ;;  %v2527_v34 = vpack.c.bf16 %v1986_v10, %v1985_v52 }
 0xce3   : > { %2526 = vmatprep.subr.bf16.mxu0 %v2783_v5 }
 0xce4   : > { %1944 = vrot.lane.b32.xlu1 %v904_v21, %s2795_s18  ;;  %s304_s18 = sand.u32 1, %s2765_s25  }
 0xce5   : > { %s2069_s15 = scalar_lea.sflag [#allocation3], %s304_s18 }
 0xce6   : > { %2528 = vmatpush3.bf16.msra.mxu0 %v2527_v34 }
 0xce8   : > { %1952 = vrot.lane.b32.xlu1 %v1250_v12, %s2796_s19  ;;  %s2171_s19 = sshll.u32 %s304_s18, 3 }
 0xce9   : > { %s306_s23 = scalar_lea.vmem [#allocation2], %s2171_s19 }
 0xcea   : > { %s2083_s30 = sshll.u32 %s306_s23, 4  ;;  %s3164_s30 = int_to_ptr.vmem [resolvable:$true] %s2083_s30 }
 0xceb   : > { %s2703_s16 = scalar_lea.vmem %s3164_s30, 128 }
 0xcec   : > { %1956 = vrot.lane.b32.xlu1 %v1423_v23, %s2797_s20  ;;  %p2704_p12 = scmp.ne.s32.totalorder %s3164_s30, %s2703_s16 }
 0xcee   : > { %p2705_p13 = pnand %p2704_p12, %p2881_p4 }
 0xcf0   : > { %1964 = vrot.lane.b32.xlu1 %v1769_v28, %s2798_s21  ;;  %p2706_p0 = pneg %p2705_p13 }
 0xd47   : > { %v1949_v44 = vpop.permute.xlu0 %1948 }
 0xd52   : > { %v1961_v49 = vpop.permute.xlu0 %1960 }
 0xd60   : > { %v1861_v24 = vpop.xlane.xlu1 %1860 }
 0xd61   : > { %2699 = vrcp.f32 %v1861_v24 }
 0xd62   : > { %2701 = vrcp.f32 %v654_v38 }
 0xd64   : > { %v1945_v39 = vpop.permute.xlu1 %1944 }
 0xd68   : > { %v1953_v40 = vpop.permute.xlu1 %1952 }
 0xd6b   : > { %v2700_v29 = vpop.eup %2699 }
 0xd6c   : > { %v2702_v41 = vpop.eup %2701  ;;  %v1957_v5 = vpop.permute.xlu1 %1956 }
 0xd6d   : > { %v729_v42 = vmul.f32 %v2702_v41, %v2996_v51 }
 0xd6f   : > { %v1971_v43 = vsel %vm564_vm2, %v729_v42, %v1945_v39 }
 0xd70   : > { %v1973_v45 = vsel %vm1972_vm5, %v1971_v43, %v1949_v44  ;;  %v1965_v53 = vpop.permute.xlu1 %1964 }
 0xd71   : > { %v1975_v46 = vsel %vm1974_vm6, %v1973_v45, %v1953_v40 }
 0xd72   : > { %v1976_v50 = vsel %vm645_vm4, %v1975_v46, %v1957_v5 }
 0xd73   : > { %v1978_v32 = vsel %vm1977_vm7, %v1976_v50, %v1961_v49 }
 0xd74   : > { %v1980_v54 = vsel %vm1979_vm8, %v1978_v32, %v1965_v53 }
 0xda5   : > { %v1937_v35 = vpop.f32.mrb[16].mxu0 }
 0xda6   : > { %v1942_v36 = vmul.f32 %v2700_v29, %v1937_v35  ;;  %v2433_v37 = vpop.f32.mrb[17].mxu0 }
 0xda8   : > { %1968 = vrot.lane.b32.xlu0 %v1942_v36, %s2799_s17  ;;  %s2707_s17 = sshll.u32 %s2800_s27, 4  ;;  %s2708_s17 = int_to_ptr.vmem [resolvable:$false] %s2707_s17 }
 0xda9   : > { %s2709_s19 = scalar_lea.vmem %s2708_s17, 256  ;;  %p2710_p1 = scmp.lt.s32.totalorder %s3164_s30, %s2708_s17 }
 0xdaa   : > { %p2711_p2 = scmp.lt.s32.totalorder %s2709_s19, %s2703_s16 }
 0xdac   : > { %p2712_p3 = por %p2711_p2, %p2710_p1 }
 0xdae   : > { %p2713_p5 = pnand %p2712_p3, %p2706_p0 }
 0xe1a   : > { %v1969_v51 = vpop.permute.xlu0 %1968 }
 0xe1b   : > { %v1982_v3 = vsel %vm1981_vm9, %v1980_v54, %v1969_v51 }
 0xe1c   : > { %2443 = vmatmul.mubr.msk.f32.vlgmr.msra.gmra.mrb[18].mxu0 %vm326_vm1, %v1982_v3 }
 0xeef   : > { %v2063_v48 = vpop.f32.mrb[18].mxu0 }
 0xef0   : > { %v2064_v56 = vadd.f32 %v2212_v55, %v2063_v48  ;;  %v2444_v57 = vpop.f32.mrb[19].mxu0 }
 0xef2   : > { %2067 = vst.msk [vmem:[%s306_s23] sm:$0xff] %vm326_vm1, %v2064_v56 }
 0xef3   : > { %2716 = shalt.err (!%p2713_p5)
}
 0xef4   : > { %s2717_s18 = scalar_lea.hbm %s3162_s12, 128  ;;  %s2721_s22 = scalar_lea.hbm %s3217_s7, 256 }
 0xef5   : > { %p2718_p6 = scmp.ne.s32.totalorder %s3162_s12, %s2717_s18  ;;  %p2722_p10 = scmp.lt.u32.totalorder %s3162_s12, %s3217_s7 }
 0xef6   : > { %p2723_p11 = scmp.lt.u32.totalorder %s2721_s22, %s2717_s18  ;;  %p2725_p13 = scmp.lt.u32.totalorder %s2717_s18, %s3162_s12 }
 0xef7   : > { %p2719_p7 = pnand %p2718_p6, %p2881_p4 }
 0xef8   : > { %p2724_p12 = por %p2723_p11, %p2722_p10 }
 0xef9   : > { %p2720_p9 = pneg %p2719_p7 }
 0xefa   : > { %p2726_p0 = por %p2725_p13, %p2724_p12 }
 0xefc   : > { %p2727_p1 = pnand %p2726_p0, %p2720_p9 }
 0xefe   : > { %2730 = shalt.err (!%p2727_p1)
}
 0xeff   : > { %2529 = dma.vmem_to_hbm [thread:$0]  (%p2881_p4), %s3164_s30, 128, %s3162_s12, %s2069_s15  }
 0xf00 PF: > { %p2535_p2 = scmp.ge.s32.totalorder %s2781_s29, 2  ;;  %s2095_s10 = sand.u32 1, %s2761_s24  }
 0xf01   : > { %s2096_s16 = scalar_lea.sflag [#allocation3], %s2095_s10 }
 0xf02   : > { %p2532_p3 = pnand %p2535_p2, %p2888_p8 }
 0xf04   : > { %2756 = dma.done.wait (!%p2532_p3), %s2096_s16, 128  }
 0xf05   : > { %2758 = vsyncadd (!%p2532_p3), %s2096_s16, 4294967168  ;;  %s20_s29 = sadd.s32 1, %s2781_s29   ;;  %s3222_s24 = smov %s2765_s25 }
 0xf06   : > { %p17_p5 = scmp.ge.s32.totalorder %s20_s29, 4   ;;  %s3223_s25 = smov %s2769_s26 }
 0xf07   : > { %s3224_s26 = smov %s2894_s14  ;;  %s3225_s27 = smov %s2777_s28 }
 0xf08   : > { %s3226_s28 = smov %s3228_s9  ;;  %19 = sbr.rel (!%p17_p5) target bundleno = 4 (0x4), region = 86 }
 0xf0f   :  { %2101 = vsyncpa [#allocation3], 1 }
 0xf10   :  { %2103 = vsyncpa [#allocation3 + $0x1], 1 }

</bundles_post_ra>
